<compile_context>
chip_gen: v5e
topology: v5e:2x2
jax: 0.10.0
libtpu: 0.0.40
codegen_flags: <defaults>
</compile_context>

<pallas_src>
import jax
import jax.numpy as jnp
from jax.experimental import pallas as pl
from jax.experimental.pallas import tpu as pltpu

ENC_HIDDEN = 32   # config.chat_encoder_gru_hidden_size
DEC_HIDDEN = 32   # config.chat_decoder_gru_hidden_size


def _concat_attn_kernel(enc_ref, dec_ref, wa_enc_ref, wa_dec_ref,
                        va_wt_ref, va_b_ref, out_ref):
    # enc_ref:   (B, S, E)  VMEM
    # dec_ref:   (B, D)     VMEM  (last-layer decoder hidden)
    # wa_enc_ref:(E, D)     VMEM
    # wa_dec_ref:(D, D)     VMEM
    # va_wt_ref: (1, D)     VMEM  (Va weight as a row vector)
    # va_b_ref:  (1, 1)     SMEM  (Va bias scalar)
    # out_ref:   (B, S)     VMEM
    B, S, E = enc_ref.shape
    D = wa_enc_ref.shape[1]

    # Encoder branch: one fused matmul for the whole batch.
    enc2d = enc_ref[...].reshape(B * S, E)                                   # [B*S, E]
    h_enc = jnp.dot(enc2d, wa_enc_ref[...],
                    preferred_element_type=jnp.float32).reshape(B, S, D)     # [B, S, D]

    # Decoder branch: projected once for the whole batch, broadcast over seq.
    dec_proj = jnp.dot(dec_ref[...], wa_dec_ref[...],
                       preferred_element_type=jnp.float32)                   # [B, D]

    h = jnp.tanh(h_enc + dec_proj[:, None, :])                               # [B, S, D]

    # Va(h): contract D while keeping S on the lane axis -> [B, 1, S].
    va = jnp.broadcast_to(va_wt_ref[...], (B, 1, D))                         # [B, 1, D]
    score = jnp.einsum('bod,bsd->bos', va, h,
                       preferred_element_type=jnp.float32)[:, 0, :]          # [B, S]
    score = score + va_b_ref[0, 0]                                           # scalar from SMEM

    # Numerically-stable softmax over the seq (lane) axis; single (B, S) store.
    score = score - jnp.max(score, axis=-1, keepdims=True)
    e = jnp.exp(score)
    out_ref[...] = (e / jnp.sum(e, axis=-1, keepdims=True)).astype(out_ref.dtype)


def chat_decoder_attention(encoder_outputs, decoder_hidden_state,
                           wa_weight, va_weight, va_bias):
    """encoder_outputs: [B, S, E]; decoder_hidden_state: [L, B, D];
    wa_weight: [E+D, D]; va_weight: [D, 1]; va_bias: [1].  Returns [B, S]."""
    B, S, E = encoder_outputs.shape
    D = decoder_hidden_state.shape[-1]

    dec_last = decoder_hidden_state[-1]                  # [B, D]
    wa_enc = wa_weight[:E]                               # [E, D]
    wa_dec = wa_weight[E:]                               # [D, D]
    va_wt = va_weight.reshape(1, D)                      # [1, D] row vector
    va_b = va_bias.reshape(1, 1).astype(jnp.float32)     # [1, 1] scalar -> SMEM

    vmem = pl.BlockSpec(memory_space=pltpu.MemorySpace.VMEM)
    smem = pl.BlockSpec(memory_space=pltpu.MemorySpace.SMEM)

    return pl.pallas_call(
        _concat_attn_kernel,
        out_shape=jax.ShapeDtypeStruct((B, S), jnp.float32),
        in_specs=[vmem, vmem, vmem, vmem, vmem, smem],
        out_specs=vmem,
    )(encoder_outputs, dec_last, wa_enc, wa_dec, va_wt, va_b)


if __name__ == "__main__":
    key = jax.random.PRNGKey(0)
    k1, k2, k3, k4, k5 = jax.random.split(key, 5)

    B, S, L = 2, 8, 2            # batch, seq_len, (bi * num_layers)
    E, D = ENC_HIDDEN, DEC_HIDDEN

    encoder_outputs = jax.random.normal(k1, (B, S, E), jnp.float32)
    decoder_hidden_state = jax.random.normal(k2, (L, B, D), jnp.float32)

    # Deterministic synthetic parameters (shapes follow nn.Linear in __init__).
    wa_weight = 0.1 * jax.random.normal(k3, (E + D, D), jnp.float32)   # Wa: (E+D) -> D, no bias
    va_weight = 0.1 * jax.random.normal(k4, (D, 1), jnp.float32)       # Va: D -> 1
    va_bias = 0.1 * jax.random.normal(k5, (1,), jnp.float32)

    out = chat_decoder_attention(encoder_outputs, decoder_hidden_state,
                                 wa_weight, va_weight, va_bias)
    out = jax.block_until_ready(out)

    # Pure-JAX reference (mirrors the PyTorch forward exactly).
    dec_last = decoder_hidden_state[-1]                                  # [B, D]
    dec_rep = jnp.repeat(dec_last[:, None, :], S, axis=1)                # [B, S, D]
    cated = jnp.concatenate([encoder_outputs, dec_rep], axis=-1)         # [B, S, E+D]
    score = jnp.tanh(cated @ wa_weight) @ va_weight + va_bias            # [B, S, 1]
    ref = jax.nn.softmax(score[..., 0], axis=-1)                         # [B, S]

    assert out.shape == (B, S)
    assert jnp.allclose(out, ref, atol=1e-5, rtol=1e-5), "mismatch vs reference"
    print("KERNEL_OK")
</pallas_src>

<mosaic_0001>
module attributes {stable_mosaic.version = 11 : i64} {
  func.func @_concat_attn_kernel(%arg0: memref<2x8x32xf32, #tpu.memory_space<vmem>>, %arg1: memref<2x32xf32, #tpu.memory_space<vmem>>, %arg2: memref<32x32xf32, #tpu.memory_space<vmem>>, %arg3: memref<32x32xf32, #tpu.memory_space<vmem>>, %arg4: memref<1x32xf32, #tpu.memory_space<vmem>>, %arg5: memref<1x1xf32, #tpu.memory_space<smem>>, %arg6: memref<2x8xf32, #tpu.memory_space<vmem>>) attributes {dimension_semantics = [], scalar_prefetch = 0 : i64, scratch_operands = 0 : i64, tpu.core_type = #tpu.core_type<tc>} {
    %c0 = arith.constant 0 : index
    %c0_0 = arith.constant 0 : index
    %c0_1 = arith.constant 0 : index
    %0 = vector.load %arg0[%c0, %c0_0, %c0_1] : memref<2x8x32xf32, #tpu.memory_space<vmem>>, vector<2x8x32xf32>
    %1 = vector.shape_cast %0 : vector<2x8x32xf32> to vector<16x32xf32>
    %c0_2 = arith.constant 0 : index
    %c0_3 = arith.constant 0 : index
    %2 = vector.load %arg2[%c0_2, %c0_3] : memref<32x32xf32, #tpu.memory_space<vmem>>, vector<32x32xf32>
    %cst = arith.constant dense<0.000000e+00> : vector<16x32xf32>
    %3 = tpu.matmul %1, %2, %cst {dimension_numbers = #tpu.dot_dimension_numbers<[1], [0], [0], [1], [0, 0, 1, 1], [], []>} : vector<16x32xf32>, vector<32x32xf32>, vector<16x32xf32> -> vector<16x32xf32>
    %4 = vector.shape_cast %3 : vector<16x32xf32> to vector<2x8x32xf32>
    %c0_4 = arith.constant 0 : index
    %c0_5 = arith.constant 0 : index
    %5 = vector.load %arg1[%c0_4, %c0_5] : memref<2x32xf32, #tpu.memory_space<vmem>>, vector<2x32xf32>
    %c0_6 = arith.constant 0 : index
    %c0_7 = arith.constant 0 : index
    %6 = vector.load %arg3[%c0_6, %c0_7] : memref<32x32xf32, #tpu.memory_space<vmem>>, vector<32x32xf32>
    %cst_8 = arith.constant dense<0.000000e+00> : vector<2x32xf32>
    %7 = tpu.matmul %5, %6, %cst_8 {dimension_numbers = #tpu.dot_dimension_numbers<[1], [0], [0], [1], [0, 0, 1, 1], [], []>} : vector<2x32xf32>, vector<32x32xf32>, vector<2x32xf32> -> vector<2x32xf32>
    %8 = vector.shape_cast %7 : vector<2x32xf32> to vector<2x1x32xf32>
    %9 = vector.broadcast %8 : vector<2x1x32xf32> to vector<2x8x32xf32>
    %10 = arith.addf %4, %9 : vector<2x8x32xf32>
    %11 = math.tanh %10 : vector<2x8x32xf32>
    %c0_9 = arith.constant 0 : index
    %c0_10 = arith.constant 0 : index
    %12 = vector.load %arg4[%c0_9, %c0_10] : memref<1x32xf32, #tpu.memory_space<vmem>>, vector<1x32xf32>
    %13 = vector.shape_cast %12 : vector<1x32xf32> to vector<1x1x32xf32>
    %14 = vector.broadcast %13 : vector<1x1x32xf32> to vector<2x1x32xf32>
    "tpu.trace_start"() <{level = 10 : i32, message = "bod,bsd->bos"}> : () -> ()
    %cst_11 = arith.constant dense<0.000000e+00> : vector<2x1x8xf32>
    %15 = tpu.matmul %14, %11, %cst_11 {dimension_numbers = #tpu.dot_dimension_numbers<[2], [2], [1], [1], [0, 0, 0, 1, 1, 1], [0], [0]>} : vector<2x1x32xf32>, vector<2x8x32xf32>, vector<2x1x8xf32> -> vector<2x1x8xf32>
    "tpu.trace_stop"() : () -> ()
    %16 = vector.shape_cast %15 : vector<2x1x8xf32> to vector<2x8xf32>
    %c0_12 = arith.constant 0 : index
    %c0_13 = arith.constant 0 : index
    %17 = memref.load %arg5[%c0_12, %c0_13] : memref<1x1xf32, #tpu.memory_space<smem>>
    %18 = vector.broadcast %17 : f32 to vector<2x8xf32>
    %19 = arith.addf %16, %18 : vector<2x8xf32>
    %cst_14 = arith.constant dense<0xFF800000> : vector<2xf32>
    %20 = vector.multi_reduction <maximumf>, %19, %cst_14 [1] : vector<2x8xf32> to vector<2xf32>
    %21 = vector.shape_cast %20 : vector<2xf32> to vector<2x1xf32>
    %22 = vector.broadcast %21 : vector<2x1xf32> to vector<2x8xf32>
    %23 = arith.subf %19, %22 : vector<2x8xf32>
    %24 = math.exp %23 : vector<2x8xf32>
    %cst_15 = arith.constant dense<0.000000e+00> : vector<2xf32>
    %25 = vector.multi_reduction <add>, %24, %cst_15 [1] : vector<2x8xf32> to vector<2xf32>
    %26 = vector.shape_cast %25 : vector<2xf32> to vector<2x1xf32>
    %27 = vector.broadcast %26 : vector<2x1xf32> to vector<2x8xf32>
    %28 = arith.divf %24, %27 : vector<2x8xf32>
    %c0_16 = arith.constant 0 : index
    %c0_17 = arith.constant 0 : index
    %29 = vector.load %arg6[%c0_16, %c0_17] : memref<2x8xf32, #tpu.memory_space<vmem>>, vector<2x8xf32>
    tpu.vector_store %arg6[%c0_16, %c0_17], %28 {strides = array<i32>} : memref<2x8xf32, #tpu.memory_space<vmem>>, vector<2x8xf32>,
    return
  }
}

</mosaic_0001>

<bundles_post_ra>
// kernel: tpu_custom_call.1
= control target key start
LH: loop header
LB: loop body
LE: loop exit
PB: predicated region body
PF: predicated region fallthrough
CT: control target
= control target key end

     0   :  { %12 = vsyncpa [#allocation4], 0  ;;  %s488_s0 = inlined_call_operand.hbm [shape: f32[2,8,32], index: 0, kind: input, shape index: {}]   ;;  %s489_s1 = inlined_call_operand.vmem [shape: f32[2,32], index: 1, kind: input, shape index: {}]   ;;  %s490_s2 = inlined_call_operand.hbm [shape: f32[32,32], index: 2, kind: input, shape index: {}]   ;;  %s491_s3 = inlined_call_operand.hbm [shape: f32[32,32], index: 3, kind: input, shape index: {}]   ;;  %s492_s4 = inlined_call_operand.vmem [shape: f32[1,32], index: 4, kind: input, shape index: {}]   ;;  %s493_s5 = inlined_call_operand.<no memory space> [shape: f32[1,1], index: 5, kind: input, shape index: {}]   ;;  %s494_s6 = inlined_call_operand.hbm [shape: f32[2,8], index: 6, kind: output, shape index: {}]  }
   0x1   :  { %13 = vsyncpa [#allocation7], 0 }
   0x2   :  { %14 = vsyncpa [#allocation5], 0  ;;  %s34_s23 = sshll.u32 %s490_s2, 4  ;;  %s413_s24 = smov [#allocation6]   ;;  %s35_s23 = int_to_ptr.hbm [resolvable:$true] %s34_s23 }
   0x3   :  { %s36_s25 = sshll.u32 %s413_s24, 4  ;;  %s19_s28 = sshll.u32 %s488_s0, 4  ;;  %s37_s25 = int_to_ptr.vmem [resolvable:$true] %s36_s25  ;;  %s20_s28 = int_to_ptr.hbm [resolvable:$true] %s19_s28 }
   0x4   :  { %s414_s29 = smov 128   ;;  %s415_s30 = smov 8  }
   0x5   :  { %42 = dma.hbm_to_vmem [thread:$0]  %s35_s23, 512, %s37_s25, [#allocation7], %s414_s29, %s414_s29, %s415_s30  }
   0x6   :  { %s416_s7 = smov [#allocation3]   ;;  %s47_s11 = sshll.u32 %s491_s3, 4  ;;  %s48_s11 = int_to_ptr.hbm [resolvable:$true] %s47_s11 }
   0x7   :  { %s21_s8 = sshll.u32 %s416_s7, 4  ;;  %s417_s2 = smov [#allocation8]   ;;  %s22_s8 = int_to_ptr.vmem [resolvable:$true] %s21_s8 }
   0x8   :  { %27 = dma.hbm_to_vmem [thread:$0]  %s20_s28, 256, %s22_s8, [#allocation4], %s414_s29, %s414_s29, %s415_s30  }
   0x9   :  { %s49_s12 = sshll.u32 %s417_s2, 4  ;;  %s50_s12 = int_to_ptr.vmem [resolvable:$true] %s49_s12 }
   0xa   :  { %55 = dma.hbm_to_vmem [thread:$0]  %s48_s11, 512, %s50_s12, [#allocation7], %s414_s29, %s414_s29, %s415_s30  }
   0xb   :  { %407 = dma.done.wait [#allocation4], 256  }
   0xc   :  { %408 = vsyncadd [#allocation4], 4294967040 }
   0xd   :  { %409 = dma.done.wait [#allocation7], 1024  }
   0xe   :  { %410 = vsyncadd [#allocation7], 4294966272  ;;  %v77_v0 = vld [vmem:[#allocation6 + $0x18] sm:$0xff]  ;;  %v76_v2 = vld [vmem:[#allocation6 + $0x10] sm:$0xff]  ;;  %vm78_vm0 = vcmask 261120   ;;  %v197_v22 = vstv %s493_s5  ;;  %vm203_vm1 = vcmask 1041409  }
   0xf   :  { %v112_v1 = vld [vmem:[#allocation8 + $0x18] sm:$0xff]  ;;  %97 = vmatpush.msra.mxu0 %v77_v0  ;;  %v111_v3 = vld [vmem:[#allocation8 + $0x10] sm:$0xff]  ;;  %v75_v4 = vld [vmem:[#allocation6 + $0x8] sm:$0xff]  ;;  %vm206_vm2 = vcmask 58368   ;;  %s275_s18 = sshll.u32 %s494_s6, 4  ;;  %s276_s18 = int_to_ptr.hbm [resolvable:$true] %s275_s18 }
  0x10   :  { %128 = vmatpush.msra.mxu1 %v112_v1  ;;  %v110_v5 = vld [vmem:[#allocation8 + $0x8] sm:$0xff]  ;;  %v74_v6 = vld [vmem:[#allocation6] sm:$0xff]  ;;  %v72_v8 = vld [vmem:[#allocation3] sm:$0xff] }
  0x11   :  { %98 = vmatpush.msra.mxu0 %v76_v2  ;;  %v109_v7 = vld [vmem:[#allocation8] sm:$0xff]  ;;  %v108_v9 = vld [vmem:[%s489_s1] sm:$0x3]  ;;  %v73_v10 = vld [vmem:[#allocation3 + $0x8] sm:$0xff] }
  0x12   :  { %129 = vmatpush.msra.mxu1 %v111_v3  ;;  %v146_v20 = vld [vmem:[%s492_s4] sm:$0x1]  ;;  %s418_s4 = smov [#allocation9]  }
  0x13   :  { %99 = vmatpush.msra.mxu0 %v75_v4  ;;  %s273_s5 = sshll.u32 %s418_s4, 4  ;;  %s274_s5 = int_to_ptr.vmem [resolvable:$true] %s273_s5 }
  0x14   :  { %130 = vmatpush.msra.mxu1 %v110_v5 }
  0x15   :  { %100 = vmatpush.msra.mxu0 %v74_v6 }
  0x16   :  { %131 = vmatpush.msra.mxu1 %v109_v7  ;;  %286 = vmatmul.msk.f32.vlgmr.msra.gmra.mxu0 %vm78_vm0, %v72_v8 }
  0x17   :  { %288 = vmatmul.msk.f32.vlgmr.msra.gmra.mxu1 %vm78_vm0, %v108_v9 }
  0x1e   :  { %287 = vmatmul.msk.f32.gmra.mxu0 %vm78_vm0, %v73_v10 }
  0x93   :  { %v102_v11 = vpop.f32.mrf.mxu0 }
  0x94   :  { %v133_v12 = vpop.f32.mrf.mxu1 }
  0x95   :  { %v137_v13 = vrot.slane %v133_v12, 1  ;;  %v138_v14 = vperm.slane %v133_v12, 0 }
  0x97   :  { %v142_v15 = vadd.f32 %v138_v14, %v102_v11  ;;  %v139_v16 = vperm.slane %v137_v13, 0 }
  0x99   :  { %299 = vtanh.f32 %v142_v15 }
  0x9b   :  { %v105_v17 = vpop.f32.mrf.mxu0 }
  0x9c   :  { %v143_v18 = vadd.f32 %v139_v16, %v105_v17 }
  0x9e   :  { %301 = vtanh.f32 %v143_v18 }
  0x9f   :  { %v300_v19 = vpop.eup %299 }
  0xa0   :  { %289 = vmatpush.xpose.msk.msra.mxu2 %vm78_vm0, %v300_v19 }
  0xa3   :  { %290 = vmatmul.msk.f32.vlgmr.msra.gmra.mxu2 %vm78_vm0, %v146_v20 }
  0xa4   :  { %v302_v21 = vpop.eup %301 }
  0xa5   :  { %291 = vmatpush.xpose.msk.msra.mxu3 %vm78_vm0, %v302_v21 }
  0xa8   :  { %292 = vmatmul.msk.f32.vlgmr.msra.gmra.mxu3 %vm78_vm0, %v146_v20 }
 0x126   :  { %v170_v23 = vpop.f32.mrf.mxu2 }
 0x127   :  { %v198_v26 = vadd.f32 %v197_v22, %v170_v23 }
 0x12b   :  { %v193_v24 = vpop.f32.mrf.mxu3 }
 0x12c   :  { %v199_v25 = vadd.f32 %v197_v22, %v193_v24 }
 0x12e   :  { %v202_v27 = vrot.slane %v199_v25, 7 }
 0x130   :  { %v204_v28 = vsel %vm203_vm1, %v202_v27, %v198_v26 }
 0x131   :  { %v207_v29 = vsel %vm206_vm2, %v204_v28, -inf }
 0x132   :  { %208 = vmax.xlane.f32.xlu0 %v207_v29 }
 0x1a5   :  { %v209_v30 = vpop.xlane.xlu0 %208 }
 0x1a6   :  { %v211_v31 = vrot.slane %v209_v30, 1  ;;  %v214_v32 = vsub.f32 %v198_v26, %v209_v30 }
 0x1a8   :  { %v215_v33 = vsub.f32 %v199_v25, %v211_v31  ;;  %v216_v34 = vmul.f32 1.442695, %v214_v32 }
 0x1aa   :  { %v218_v35 = vmul.f32 1.442695, %v215_v33 }
 0x1ac   :  { %303 = vpow2.f32 %v218_v35 }
 0x1ad   :  { %305 = vpow2.f32 %v216_v34 }
 0x1b2   :  { %v304_v36 = vpop.eup %303 }
 0x1b3   :  { %v222_v37 = vrot.slane %v304_v36, 7  ;;  %v306_v38 = vpop.eup %305 }
 0x1b5   :  { %v223_v39 = vsel %vm203_vm1, %v222_v37, %v306_v38 }
 0x1b6   :  { %v225_v40 = vsel %vm206_vm2, %v223_v39, 0.0 }
 0x1b7   :  { %226 = vadd.xlane.f32.xlu0 %v225_v40 }
 0x22a   :  { %v227_v41 = vpop.xlane.xlu0 %226 }
 0x22b   :  { %v229_v42 = vrot.slane %v227_v41, 1  ;;  %307 = vrcp.f32 %v227_v41  ;;  %vm237_vm4 = vweird.f32 %v227_v41  ;;  %v241_v50 = vand.u32 2147483647, %v227_v41 }
 0x22c   :  { %v243_v51 = vand.u32 2147483648, %v227_v41 }
 0x22d   :  { %309 = vrcp.f32 %v229_v42  ;;  %v258_v52 = vand.u32 2147483648, %v229_v42  ;;  %v256_v55 = vand.u32 2147483647, %v229_v42  ;;  %vm252_vm7 = vweird.f32 %v229_v42 }
 0x22e   :  { %v244_v58 = vor.u32 1.1754944e-38, %v243_v51  ;;  %vm242_vm9 = vcmp.eq.f32.partialorder %v241_v50, 8.507059e+37 }
 0x22f   :  { %v259_v59 = vor.u32 1.1754944e-38, %v258_v52  ;;  %vm257_vm10 = vcmp.eq.f32.partialorder %v256_v55, 8.507059e+37 }
 0x231   :  { %v308_v43 = vpop.eup %307 }
 0x232   :  { %v233_v44 = vmul.f32 %v308_v43, %v227_v41  ;;  %vm238_vm3 = vweird.f32 %v308_v43 }
 0x233   :  { %v310_v45 = vpop.eup %309  ;;  %vm239_vm6 = vmor %vm237_vm4, %vm238_vm3 }
 0x234   :  { %v234_v46 = vsub.f32 1.0, %v233_v44  ;;  %v248_v47 = vmul.f32 %v310_v45, %v229_v42  ;;  %vm253_vm5 = vweird.f32 %v310_v45 }
 0x235   :  { %vm254_vm8 = vmor %vm252_vm7, %vm253_vm5 }
 0x236   :  { %v235_v48 = vmul.f32 %v308_v43, %v234_v46  ;;  %v249_v49 = vsub.f32 1.0, %v248_v47 }
 0x238   :  { %v236_v53 = vadd.f32 %v308_v43, %v235_v48  ;;  %v250_v54 = vmul.f32 %v310_v45, %v249_v49 }
 0x23a   :  { %v240_v56 = vsel %vm239_vm6, %v308_v43, %v236_v53  ;;  %v251_v57 = vadd.f32 %v310_v45, %v250_v54 }
 0x23b   :  { %v245_v61 = vsel %vm242_vm9, %v244_v58, %v240_v56 }
 0x23c   :  { %v255_v60 = vsel %vm254_vm8, %v310_v45, %v251_v57  ;;  %v246_v0 = vmul.f32 %v306_v38, %v245_v61 }
 0x23d   :  { %v260_v62 = vsel %vm257_vm10, %v259_v59, %v255_v60 }
 0x23e   :  { %v261_v63 = vmul.f32 %v304_v36, %v260_v62 }
 0x240   :  { %v264_v1 = vrot.slane %v261_v63, 7 }
 0x242   :  { %v265_v2 = vsel %vm203_vm1, %v264_v1, %v246_v0 }
 0x243   :  { %267 = vst.msk [vmem:[#allocation9] sm:$0x3] %vm206_vm2, %v265_v2 }
 0x244   :  { %278 = dma.vmem_to_hbm [thread:$0]  %s274_s5, 32, %s276_s18, [#allocation5]  }
 0x245   :  { %411 = dma.done.wait [#allocation5], 32  }
 0x246   :  { %412 = vsyncadd [#allocation5], 4294967264 }
 0x247   :  { %283 = vsyncpa [#allocation4], 1 }
 0x248   :  { %284 = vsyncpa [#allocation7], 1 }
 0x249   :  { %285 = vsyncpa [#allocation5], 1 }

</bundles_post_ra>
